<compile_context>
chip_gen: v6e
topology: v6e:2x2x1
jax: 0.10.0
libtpu: 0.0.40
codegen_flags: <defaults>
</compile_context>

<pallas_src>
import jax
import jax.numpy as jnp
from jax.experimental import pallas as pl
from jax.experimental.pallas import tpu as pltpu


def _param_encoder_kernel(pv_ref, w_ref, b_ref, g_ref, be_ref, out_ref):
    # pv_ref : (TS, 768) f32    w_ref : (768, D) bf16
    # b_ref / g_ref / be_ref : (1, D) f32        out_ref : (TS, D)
    pv = pv_ref[...]

    # Linear(768 -> D): bf16 MXU operands (weight pre-cast in wrapper),
    # f32 accumulation, f32 bias add.
    pe = jnp.dot(pv.astype(jnp.bfloat16), w_ref[...],
                 preferred_element_type=jnp.float32) + b_ref[...]

    # LayerNorm over the model dim (biased variance, eps=1e-5), in f32.
    mu = jnp.mean(pe, axis=-1, keepdims=True)
    xc = pe - mu
    var = jnp.mean(xc * xc, axis=-1, keepdims=True)
    inv = jax.lax.rsqrt(var + 1e-5)
    out_ref[...] = (xc * inv * g_ref[...] + be_ref[...]).astype(out_ref.dtype)


def _encode_rows(pv2d, w_bf16, b_ce, g_ln, b_ln, *, ts, weight_pipeline_mode):
    """pv2d: [R, 768] f32 -> [R, D] (R = B*S), 1-D grid over row tiles."""
    R, P = pv2d.shape
    D = w_bf16.shape[1]
    grid = (pl.cdiv(R, ts),)

    def const_spec(arr):
        # Grid-invariant block: constant index_map; optionally single-buffered.
        nd = arr.ndim
        return pl.BlockSpec(arr.shape, lambda i, _nd=nd: (0,) * _nd,
                            pipeline_mode=weight_pipeline_mode)

    return pl.pallas_call(
        _param_encoder_kernel,
        out_shape=jax.ShapeDtypeStruct((R, D), pv2d.dtype),
        grid=grid,
        in_specs=[pl.BlockSpec((ts, P), lambda i: (i, 0)),
                  const_spec(w_bf16), const_spec(b_ce),
                  const_spec(g_ln), const_spec(b_ln)],
        out_specs=pl.BlockSpec((ts, D), lambda i: (i, 0)),
        compiler_params=pltpu.CompilerParams(
            dimension_semantics=("parallel",)),
    )(pv2d, w_bf16, b_ce, g_ln, b_ln)


def param_encoder(param_vectors, params, *, tile_s=1024):
    """param_vectors: [B, S, 768] -> [B, S, d_model]."""
    B, S, P = param_vectors.shape
    D = params["w_ce"].shape[1]

    # Flatten batch x seq into one row axis (contiguous reshape, no copy).
    rows = B * S
    pv2d = param_vectors.reshape(rows, P)

    # Hoist grid-invariant casts/reshapes out of the kernel (done once).
    w_bf16 = params["w_ce"].astype(jnp.bfloat16)                  # (768, D)
    b_ce = params["b_ce"].reshape(1, D).astype(jnp.float32)
    g_ln = params["g_ln"].reshape(1, D).astype(jnp.float32)
    b_ln = params["b_ln"].reshape(1, D).astype(jnp.float32)

    # Row tile: full array if small, else a 1024-row (sublane-aligned) tile.
    ts = rows if rows <= tile_s else tile_s

    try:
        out2d = jax.block_until_ready(
            _encode_rows(pv2d, w_bf16, b_ce, g_ln, b_ln,
                         ts=ts, weight_pipeline_mode=pl.Buffered(1)))
    except Exception:
        # Fallback: default double-buffered pipeline mode for the weights
        # (only costs ~0.4 MiB of VMEM at D=128).
        out2d = _encode_rows(pv2d, w_bf16, b_ce, g_ln, b_ln,
                             ts=ts, weight_pipeline_mode=None)

    return out2d.reshape(B, S, D)


def _reference(param_vectors, params):
    """Pure-JAX (f32) reference mirroring the PyTorch forward."""
    pe = param_vectors @ params["w_ce"] + params["b_ce"]
    mu = jnp.mean(pe, axis=-1, keepdims=True)
    xc = pe - mu
    var = jnp.mean(xc * xc, axis=-1, keepdims=True)
    return xc * jax.lax.rsqrt(var + 1e-5) * params["g_ln"] + params["b_ln"]


if __name__ == "__main__":
    # Small shapes consistent with the module: the 768 input dim is hard-coded;
    # d_model = 128 keeps the output lane-dense (full 128-lane stores).
    B, S, P, D = 2, 8, 768, 128

    key = jax.random.PRNGKey(0)
    ks = jax.random.split(key, 6)

    def rnd(k, shape, scale=0.05):
        return (scale * jax.random.normal(k, shape)).astype(jnp.float32)

    params = {
        "w_ce": rnd(ks[0], (P, D)),                                  # Linear weight (x @ W)
        "b_ce": rnd(ks[1], (1, D)),                                  # Linear bias
        "g_ln": (1.0 + 0.1 * jax.random.normal(ks[2], (1, D))).astype(jnp.float32),
        "b_ln": rnd(ks[3], (1, D)),                                  # LayerNorm beta
    }

    param_vectors = jax.random.normal(ks[4], (B, S, P), dtype=jnp.float32)

    out = param_encoder(param_vectors, params)
    out = jax.block_until_ready(out)

    ref = _reference(param_vectors, params)
    assert out.shape == (B, S, D)
    # Tolerance accounts for bf16 MXU operands (f32 accumulation).
    assert jnp.allclose(out, ref, rtol=2e-2, atol=1e-2), "mismatch vs reference"

    print("KERNEL_OK")
</pallas_src>

<mosaic_0001>
module attributes {stable_mosaic.version = 11 : i64} {
  func.func @_param_encoder_kernel(%arg0: i32, %arg1: memref<16x768xf32, #tpu.memory_space<vmem>>, %arg2: memref<768x128xbf16, #tpu.memory_space<vmem>>, %arg3: memref<1x128xf32, #tpu.memory_space<vmem>>, %arg4: memref<1x128xf32, #tpu.memory_space<vmem>>, %arg5: memref<1x128xf32, #tpu.memory_space<vmem>>, %arg6: memref<16x128xf32, #tpu.memory_space<vmem>>) attributes {dimension_semantics = [#tpu.dimension_semantics<parallel>], iteration_bounds = array<i64: 1>, scalar_prefetch = 0 : i64, scratch_operands = 0 : i64, tpu.core_type = #tpu.core_type<tc>, window_params = [{transform_indices = @transform_0, window_bounds = array<i64: 16, 768>}, {pipeline_mode = #tpu.pipeline_mode<synchronous>, transform_indices = @transform_1, window_bounds = array<i64: 768, 128>}, {pipeline_mode = #tpu.pipeline_mode<synchronous>, transform_indices = @transform_2, window_bounds = array<i64: 1, 128>}, {pipeline_mode = #tpu.pipeline_mode<synchronous>, transform_indices = @transform_3, window_bounds = array<i64: 1, 128>}, {pipeline_mode = #tpu.pipeline_mode<synchronous>, transform_indices = @transform_4, window_bounds = array<i64: 1, 128>}, {transform_indices = @transform_5, window_bounds = array<i64: 16, 128>}]} {
    %c0 = arith.constant 0 : index
    %c0_0 = arith.constant 0 : index
    %0 = vector.load %arg1[%c0, %c0_0] : memref<16x768xf32, #tpu.memory_space<vmem>>, vector<16x768xf32>
    %1 = arith.truncf %0 : vector<16x768xf32> to vector<16x768xbf16>
    %c0_1 = arith.constant 0 : index
    %c0_2 = arith.constant 0 : index
    %2 = vector.load %arg2[%c0_1, %c0_2] : memref<768x128xbf16, #tpu.memory_space<vmem>>, vector<768x128xbf16>
    %cst = arith.constant dense<0.000000e+00> : vector<16x128xf32>
    %3 = tpu.matmul %1, %2, %cst {dimension_numbers = #tpu.dot_dimension_numbers<[1], [0], [0], [1], [0, 0, 1, 1], [], []>} : vector<16x768xbf16>, vector<768x128xbf16>, vector<16x128xf32> -> vector<16x128xf32>
    %c0_3 = arith.constant 0 : index
    %c0_4 = arith.constant 0 : index
    %4 = vector.load %arg3[%c0_3, %c0_4] : memref<1x128xf32, #tpu.memory_space<vmem>>, vector<1x128xf32>
    %5 = vector.broadcast %4 : vector<1x128xf32> to vector<16x128xf32>
    %6 = arith.addf %3, %5 : vector<16x128xf32>
    %cst_5 = arith.constant dense<0.000000e+00> : vector<16xf32>
    %7 = vector.multi_reduction <add>, %6, %cst_5 [1] : vector<16x128xf32> to vector<16xf32>
    %8 = vector.shape_cast %7 : vector<16xf32> to vector<16x1xf32>
    %cst_6 = arith.constant 1.280000e+02 : f32
    %9 = vector.broadcast %cst_6 : f32 to vector<16x1xf32>
    %10 = arith.divf %8, %9 : vector<16x1xf32>
    %11 = vector.broadcast %10 : vector<16x1xf32> to vector<16x128xf32>
    %12 = arith.subf %6, %11 : vector<16x128xf32>
    %13 = arith.mulf %12, %12 : vector<16x128xf32>
    %cst_7 = arith.constant dense<0.000000e+00> : vector<16xf32>
    %14 = vector.multi_reduction <add>, %13, %cst_7 [1] : vector<16x128xf32> to vector<16xf32>
    %15 = vector.shape_cast %14 : vector<16xf32> to vector<16x1xf32>
    %cst_8 = arith.constant 1.280000e+02 : f32
    %16 = vector.broadcast %cst_8 : f32 to vector<16x1xf32>
    %17 = arith.divf %15, %16 : vector<16x1xf32>
    %cst_9 = arith.constant 9.99999974E-6 : f32
    %18 = vector.broadcast %cst_9 : f32 to vector<16x1xf32>
    %19 = arith.addf %17, %18 : vector<16x1xf32>
    %20 = math.rsqrt %19 : vector<16x1xf32>
    %21 = vector.broadcast %20 : vector<16x1xf32> to vector<16x128xf32>
    %22 = arith.mulf %12, %21 : vector<16x128xf32>
    %c0_10 = arith.constant 0 : index
    %c0_11 = arith.constant 0 : index
    %23 = vector.load %arg4[%c0_10, %c0_11] : memref<1x128xf32, #tpu.memory_space<vmem>>, vector<1x128xf32>
    %24 = vector.broadcast %23 : vector<1x128xf32> to vector<16x128xf32>
    %25 = arith.mulf %22, %24 : vector<16x128xf32>
    %c0_12 = arith.constant 0 : index
    %c0_13 = arith.constant 0 : index
    %26 = vector.load %arg5[%c0_12, %c0_13] : memref<1x128xf32, #tpu.memory_space<vmem>>, vector<1x128xf32>
    %27 = vector.broadcast %26 : vector<1x128xf32> to vector<16x128xf32>
    %28 = arith.addf %25, %27 : vector<16x128xf32>
    %c0_14 = arith.constant 0 : index
    %c0_15 = arith.constant 0 : index
    %29 = vector.load %arg6[%c0_14, %c0_15] : memref<16x128xf32, #tpu.memory_space<vmem>>, vector<16x128xf32>
    tpu.vector_store %arg6[%c0_14, %c0_15], %28 {strides = array<i32>} : memref<16x128xf32, #tpu.memory_space<vmem>>, vector<16x128xf32>,
    return
  }
  func.func @transform_0(%arg0: i32) -> (i32, i32) {
    %c0_i32 = arith.constant 0 : i32
    %c0_i32_0 = arith.constant 0 : i32
    return %arg0, %c0_i32 : i32, i32
  }
  func.func @transform_1(%arg0: i32) -> (i32, i32) {
    %c0_i32 = arith.constant 0 : i32
    %c0_i32_0 = arith.constant 0 : i32
    %c0_i32_1 = arith.constant 0 : i32
    return %c0_i32, %c0_i32_0 : i32, i32
  }
  func.func @transform_2(%arg0: i32) -> (i32, i32) {
    %c0_i32 = arith.constant 0 : i32
    %c0_i32_0 = arith.constant 0 : i32
    %c0_i32_1 = arith.constant 0 : i32
    return %c0_i32, %c0_i32_0 : i32, i32
  }
  func.func @transform_3(%arg0: i32) -> (i32, i32) {
    %c0_i32 = arith.constant 0 : i32
    %c0_i32_0 = arith.constant 0 : i32
    %c0_i32_1 = arith.constant 0 : i32
    return %c0_i32, %c0_i32_0 : i32, i32
  }
  func.func @transform_4(%arg0: i32) -> (i32, i32) {
    %c0_i32 = arith.constant 0 : i32
    %c0_i32_0 = arith.constant 0 : i32
    %c0_i32_1 = arith.constant 0 : i32
    return %c0_i32, %c0_i32_0 : i32, i32
  }
  func.func @transform_5(%arg0: i32) -> (i32, i32) {
    %c0_i32 = arith.constant 0 : i32
    %c0_i32_0 = arith.constant 0 : i32
    return %arg0, %c0_i32 : i32, i32
  }
}

module attributes {stable_mosaic.version = 11 : i64} {
  func.func @_param_encoder_kernel(%arg0: i32, %arg1: memref<16x768xf32, #tpu.memory_space<vmem>>, %arg2: memref<768x128xbf16, #tpu.memory_space<vmem>>, %arg3: memref<1x128xf32, #tpu.memory_space<vmem>>, %arg4: memref<1x128xf32, #tpu.memory_space<vmem>>, %arg5: memref<1x128xf32, #tpu.memory_space<vmem>>, %arg6: memref<16x128xf32, #tpu.memory_space<vmem>>) attributes {dimension_semantics = [#tpu.dimension_semantics<parallel>], iteration_bounds = array<i64: 1>, scalar_prefetch = 0 : i64, scratch_operands = 0 : i64, tpu.core_type = #tpu.core_type<tc>, window_params = [{transform_indices = @transform_0, window_bounds = array<i64: 16, 768>}, {pipeline_mode = #tpu.pipeline_mode<synchronous>, transform_indices = @transform_1, window_bounds = array<i64: 768, 128>}, {pipeline_mode = #tpu.pipeline_mode<synchronous>, transform_indices = @transform_2, window_bounds = array<i64: 1, 128>}, {pipeline_mode = #tpu.pipeline_mode<synchronous>, transform_indices = @transform_3, window_bounds = array<i64: 1, 128>}, {pipeline_mode = #tpu.pipeline_mode<synchronous>, transform_indices = @transform_4, window_bounds = array<i64: 1, 128>}, {transform_indices = @transform_5, window_bounds = array<i64: 16, 128>}]} {
    %c0 = arith.constant 0 : index
    %c0_0 = arith.constant 0 : index
    %0 = vector.load %arg1[%c0, %c0_0] : memref<16x768xf32, #tpu.memory_space<vmem>>, vector<16x768xf32>
    %1 = arith.truncf %0 : vector<16x768xf32> to vector<16x768xbf16>
    %c0_1 = arith.constant 0 : index
    %c0_2 = arith.constant 0 : index
    %2 = vector.load %arg2[%c0_1, %c0_2] : memref<768x128xbf16, #tpu.memory_space<vmem>>, vector<768x128xbf16>
    %cst = arith.constant dense<0.000000e+00> : vector<16x128xf32>
    %3 = tpu.matmul %1, %2, %cst {dimension_numbers = #tpu.dot_dimension_numbers<[1], [0], [0], [1], [0, 0, 1, 1], [], []>} : vector<16x768xbf16>, vector<768x128xbf16>, vector<16x128xf32> -> vector<16x128xf32>
    %c0_3 = arith.constant 0 : index
    %c0_4 = arith.constant 0 : index
    %4 = vector.load %arg3[%c0_3, %c0_4] : memref<1x128xf32, #tpu.memory_space<vmem>>, vector<1x128xf32>
    %5 = vector.broadcast %4 : vector<1x128xf32> to vector<16x128xf32>
    %6 = arith.addf %3, %5 : vector<16x128xf32>
    %cst_5 = arith.constant dense<0.000000e+00> : vector<16xf32>
    %7 = vector.multi_reduction <add>, %6, %cst_5 [1] : vector<16x128xf32> to vector<16xf32>
    %8 = vector.shape_cast %7 : vector<16xf32> to vector<16x1xf32>
    %cst_6 = arith.constant 1.280000e+02 : f32
    %9 = vector.broadcast %cst_6 : f32 to vector<16x1xf32>
    %10 = arith.divf %8, %9 : vector<16x1xf32>
    %11 = vector.broadcast %10 : vector<16x1xf32> to vector<16x128xf32>
    %12 = arith.subf %6, %11 : vector<16x128xf32>
    %13 = arith.mulf %12, %12 : vector<16x128xf32>
    %cst_7 = arith.constant dense<0.000000e+00> : vector<16xf32>
    %14 = vector.multi_reduction <add>, %13, %cst_7 [1] : vector<16x128xf32> to vector<16xf32>
    %15 = vector.shape_cast %14 : vector<16xf32> to vector<16x1xf32>
    %cst_8 = arith.constant 1.280000e+02 : f32
    %16 = vector.broadcast %cst_8 : f32 to vector<16x1xf32>
    %17 = arith.divf %15, %16 : vector<16x1xf32>
    %cst_9 = arith.constant 9.99999974E-6 : f32
    %18 = vector.broadcast %cst_9 : f32 to vector<16x1xf32>
    %19 = arith.addf %17, %18 : vector<16x1xf32>
    %20 = math.rsqrt %19 : vector<16x1xf32>
    %21 = vector.broadcast %20 : vector<16x1xf32> to vector<16x128xf32>
    %22 = arith.mulf %12, %21 : vector<16x128xf32>
    %c0_10 = arith.constant 0 : index
    %c0_11 = arith.constant 0 : index
    %23 = vector.load %arg4[%c0_10, %c0_11] : memref<1x128xf32, #tpu.memory_space<vmem>>, vector<1x128xf32>
    %24 = vector.broadcast %23 : vector<1x128xf32> to vector<16x128xf32>
    %25 = arith.mulf %22, %24 : vector<16x128xf32>
    %c0_12 = arith.constant 0 : index
    %c0_13 = arith.constant 0 : index
    %26 = vector.load %arg5[%c0_12, %c0_13] : memref<1x128xf32, #tpu.memory_space<vmem>>, vector<1x128xf32>
    %27 = vector.broadcast %26 : vector<1x128xf32> to vector<16x128xf32>
    %28 = arith.addf %25, %27 : vector<16x128xf32>
    %c0_14 = arith.constant 0 : index
    %c0_15 = arith.constant 0 : index
    %29 = vector.load %arg6[%c0_14, %c0_15] : memref<16x128xf32, #tpu.memory_space<vmem>>, vector<16x128xf32>
    tpu.vector_store %arg6[%c0_14, %c0_15], %28 {strides = array<i32>} : memref<16x128xf32, #tpu.memory_space<vmem>>, vector<16x128xf32>,
    return
  }
  func.func @transform_0(%arg0: i32) -> (i32, i32) {
    %c0_i32 = arith.constant 0 : i32
    %c0_i32_0 = arith.constant 0 : i32
    return %arg0, %c0_i32 : i32, i32
  }
  func.func @transform_1(%arg0: i32) -> (i32, i32) {
    %c0_i32 = arith.constant 0 : i32
    %c0_i32_0 = arith.constant 0 : i32
    %c0_i32_1 = arith.constant 0 : i32
    return %c0_i32, %c0_i32_0 : i32, i32
  }
  func.func @transform_2(%arg0: i32) -> (i32, i32) {
    %c0_i32 = arith.constant 0 : i32
    %c0_i32_0 = arith.constant 0 : i32
    %c0_i32_1 = arith.constant 0 : i32
    return %c0_i32, %c0_i32_0 : i32, i32
  }
  func.func @transform_3(%arg0: i32) -> (i32, i32) {
    %c0_i32 = arith.constant 0 : i32
    %c0_i32_0 = arith.constant 0 : i32
    %c0_i32_1 = arith.constant 0 : i32
    return %c0_i32, %c0_i32_0 : i32, i32
  }
  func.func @transform_4(%arg0: i32) -> (i32, i32) {
    %c0_i32 = arith.constant 0 : i32
    %c0_i32_0 = arith.constant 0 : i32
    %c0_i32_1 = arith.constant 0 : i32
    return %c0_i32, %c0_i32_0 : i32, i32
  }
  func.func @transform_5(%arg0: i32) -> (i32, i32) {
    %c0_i32 = arith.constant 0 : i32
    %c0_i32_0 = arith.constant 0 : i32
    return %arg0, %c0_i32 : i32, i32
  }
}

</mosaic_0001>

<bundles_post_ra>
// kernel: tpu_custom_call.1
= control target key start
LH: loop header
LB: loop body
LE: loop exit
PB: predicated region body
PF: predicated region fallthrough
CT: control target
= control target key end

     0   :  { %10 = vsyncpa [#allocation3], 0  ;;  %s944_s0 = inlined_call_operand.hbm [shape: f32[16,768], index: 0, kind: input, shape index: {}]   ;;  %s945_s1 = inlined_call_operand.hbm [shape: bf16[768,128], index: 1, kind: input, shape index: {}]   ;;  %s946_s2 = inlined_call_operand.vmem [shape: f32[1,128], index: 2, kind: input, shape index: {}]   ;;  %s947_s3 = inlined_call_operand.vmem [shape: f32[1,128], index: 3, kind: input, shape index: {}]   ;;  %s948_s4 = inlined_call_operand.vmem [shape: f32[1,128], index: 4, kind: input, shape index: {}]   ;;  %s949_s5 = inlined_call_operand.hbm [shape: f32[16,128], index: 5, kind: output, shape index: {}]  }
   0x1   :  { %11 = vsyncpa [#allocation6], 0 }
   0x2   :  { %12 = vsyncpa [#allocation4], 0  ;;  %s887_s18 = smov [#allocation2]  }
   0x3   :  { %s18_s19 = sshll.u32 %s887_s18, 4  ;;  %s19_s19 = int_to_ptr.vmem [resolvable:$true] %s18_s19 }
   0x4   :  { %s829_s20 = scalar_lea.vmem %s19_s19, 1536  ;;  %p834_p1 = scmp.lt.s32.totalorder %s19_s19, %s19_s19 }
   0x5   :  { %p830_p0 = scmp.ne.s32.totalorder %s19_s19, %s829_s20  ;;  %p835_p2 = scmp.lt.s32.totalorder %s829_s20, %s829_s20 }
   0x7   :  { %p836_p3 = por %p835_p2, %p834_p1 }
   0x9   :  { %p837_p4 = pnand %p836_p3, %p830_p0 }
   0xb   :  { %840 = shalt.err (!%p837_p4)
}
   0xc   :  { %s888_s21 = smov 768   ;;  %s889_s22 = smov 48  }
   0xd   :  { %24 = dma.hbm_to_vmem [thread:$0]  %s944_s0, 1536, %s19_s19, [#allocation3], %s888_s21, %s888_s21, %s889_s22  }
   0xe   :  { %s890_s25 = smov [#allocation5]  }
   0xf   :  { %s30_s26 = sshll.u32 %s890_s25, 4  ;;  %s31_s26 = int_to_ptr.vmem [resolvable:$true] %s30_s26 }
  0x10   :  { %s849_s27 = scalar_lea.vmem %s31_s26, 6144  ;;  %p854_p6 = scmp.lt.s32.totalorder %s31_s26, %s31_s26 }
  0x11   :  { %p850_p5 = scmp.ne.s32.totalorder %s31_s26, %s849_s27  ;;  %p855_p7 = scmp.lt.s32.totalorder %s849_s27, %s849_s27 }
  0x13   :  { %p856_p8 = por %p855_p7, %p854_p6 }
  0x15   :  { %p857_p9 = pnand %p856_p8, %p850_p5 }
  0x17   :  { %860 = shalt.err (!%p857_p9)
}
  0x18   :  { %s891_s28 = smov 64   ;;  %s892_s29 = smov 4  }
  0x19   :  { %36 = dma.hbm_to_vmem [thread:$0]  %s945_s1, 6144, %s31_s26, [#allocation6], %s891_s28, %s891_s28, %s892_s29  }
  0x1a   :  { %881 = dma.done.wait [#allocation3], 1536  }
  0x1b   :  { %882 = vsyncadd [#allocation3], 4294965760 }
  0x1c   :  { %883 = dma.done.wait [#allocation6], 6144  }
  0x1d   :  { %884 = vsyncadd [#allocation6], 4294961152  ;;  %v769_v0 = vld [vmem:[#allocation5 + $0x78] sm:$0xff]   ;;  %v773_v4 = vld [vmem:[#allocation5 + $0x70] sm:$0xff]   ;;  %s893_s10 = smov [#allocation7]  }
  0x1e   :  { %v770_v1 = vld [vmem:[#allocation5 + $0x38] sm:$0xff]   ;;  %694 = vmatprep.subr.bf16.mxu0 %v769_v0  ;;  %v774_v5 = vld [vmem:[#allocation5 + $0x30] sm:$0xff]   ;;  %v777_v8 = vld [vmem:[#allocation5 + $0x68] sm:$0xff]   ;;  %s630_s11 = sshll.u32 %s893_s10, 4  ;;  %s631_s11 = int_to_ptr.vmem [resolvable:$true] %s630_s11 }
  0x1f   :  { %v771_v2 = vld [vmem:[#allocation5 + $0xf8] sm:$0xff]   ;;  %695 = vmatpush3.bf16.msra.mxu0 %v770_v1  ;;  %v775_v6 = vld [vmem:[#allocation5 + $0xf0] sm:$0xff]   ;;  %v778_v9 = vld [vmem:[#allocation5 + $0x28] sm:$0xff]   ;;  %s861_s12 = scalar_lea.vmem %s631_s11, 256  ;;  %p866_p11 = scmp.lt.s32.totalorder %s631_s11, %s631_s11 }
  0x20   :  { %v772_v3 = vld [vmem:[#allocation5 + $0xb8] sm:$0xff]   ;;  %716 = vmatprep.subr.bf16.mxu1 %v771_v2  ;;  %696 = vmatprep.subr.bf16.mxu0 %v773_v4  ;;  %v776_v7 = vld [vmem:[#allocation5 + $0xb0] sm:$0xff]   ;;  %v779_v10 = vld [vmem:[#allocation5 + $0xe8] sm:$0xff]   ;;  %p862_p10 = scmp.ne.s32.totalorder %s631_s11, %s861_s12  ;;  %p867_p12 = scmp.lt.s32.totalorder %s861_s12, %s861_s12 }
  0x21   :  { %717 = vmatpush3.bf16.msra.mxu1 %v772_v3  ;;  %v780_v11 = vld [vmem:[#allocation5 + $0xa8] sm:$0xff]   ;;  %v781_v12 = vld [vmem:[#allocation5 + $0x60] sm:$0xff]   ;;  %v785_v16 = vld [vmem:[#allocation5 + $0x58] sm:$0xff]  }
  0x22   :  { %718 = vmatprep.subr.bf16.mxu1 %v775_v6  ;;  %v782_v13 = vld [vmem:[#allocation5 + $0x20] sm:$0xff]   ;;  %v786_v17 = vld [vmem:[#allocation5 + $0x18] sm:$0xff]   ;;  %v789_v20 = vld [vmem:[#allocation5 + $0x50] sm:$0xff]   ;;  %p868_p13 = por %p867_p12, %p866_p11 }
  0x23   :  { %697 = vmatpush3.bf16.msra.mxu0 %v774_v5  ;;  %v783_v14 = vld [vmem:[#allocation5 + $0xe0] sm:$0xff]   ;;  %v787_v18 = vld [vmem:[#allocation5 + $0xd8] sm:$0xff]   ;;  %v790_v21 = vld [vmem:[#allocation5 + $0x10] sm:$0xff]  }
  0x24   :  { %698 = vmatprep.subr.bf16.mxu0 %v777_v8  ;;  %v784_v15 = vld [vmem:[#allocation5 + $0xa0] sm:$0xff]   ;;  %v788_v19 = vld [vmem:[#allocation5 + $0x98] sm:$0xff]   ;;  %v791_v22 = vld [vmem:[#allocation5 + $0xd0] sm:$0xff]   ;;  %p869_p0 = pnand %p868_p13, %p862_p10 }
  0x25   :  { %719 = vmatpush3.bf16.msra.mxu1 %v776_v7  ;;  %v792_v23 = vld [vmem:[#allocation5 + $0x90] sm:$0xff]   ;;  %v793_v24 = vld [vmem:[#allocation5 + $0x48] sm:$0xff]   ;;  %v797_v28 = vld [vmem:[#allocation5 + $0x40] sm:$0xff]  }
  0x26   :  { %720 = vmatprep.subr.bf16.mxu1 %v779_v10  ;;  %v794_v25 = vld [vmem:[#allocation5 + $0x8] sm:$0xff]   ;;  %v798_v29 = vld [vmem:[#allocation5] sm:$0xff]   ;;  %v57_v32 = vld [vmem:[#allocation2 + $0x38] sm:$0xff] }
  0x27   :  { %699 = vmatpush3.bf16.msra.mxu0 %v778_v9  ;;  %v795_v26 = vld [vmem:[#allocation5 + $0xc8] sm:$0xff]   ;;  %v799_v30 = vld [vmem:[#allocation5 + $0xc0] sm:$0xff]   ;;  %v56_v36 = vld [vmem:[#allocation2 + $0x30] sm:$0xff] }
  0x28   :  { %700 = vmatprep.subr.bf16.mxu0 %v781_v12  ;;  %v796_v27 = vld [vmem:[#allocation5 + $0x88] sm:$0xff]   ;;  %v800_v34 = vld [vmem:[#allocation5 + $0x80] sm:$0xff]   ;;  %v801_v38 = vld [vmem:[#allocation5 + $0x178] sm:$0xff]  }
  0x29   :  { %721 = vmatpush3.bf16.msra.mxu1 %v780_v11  ;;  %v51_v31 = vld [vmem:[#allocation2 + $0x8] sm:$0xff]  ;;  %v50_v35 = vld [vmem:[#allocation2] sm:$0xff]  ;;  %v53_v39 = vld [vmem:[#allocation2 + $0x18] sm:$0xff] }
  0x2a   :  { %722 = vmatprep.subr.bf16.mxu1 %v783_v14  ;;  %v63_v33 = vpack.c.bf16 %v57_v32, %v51_v31  ;;  %v62_v37 = vpack.c.bf16 %v56_v36, %v50_v35  ;;  %v59_v40 = vld [vmem:[#allocation2 + $0x48] sm:$0xff]  ;;  %v802_v42 = vld [vmem:[#allocation5 + $0x138] sm:$0xff]   ;;  %v52_v43 = vld [vmem:[#allocation2 + $0x10] sm:$0xff] }
  0x2b   :  { %701 = vmatpush3.bf16.msra.mxu0 %v782_v13  ;;  %v65_v41 = vpack.c.bf16 %v59_v40, %v53_v39  ;;  %v58_v44 = vld [vmem:[#allocation2 + $0x40] sm:$0xff]  ;;  %v803_v46 = vld [vmem:[#allocation5 + $0x170] sm:$0xff]   ;;  %v805_v48 = vld [vmem:[#allocation5 + $0x168] sm:$0xff]  }
  0x2c   :  { %702 = vmatprep.subr.bf16.mxu0 %v785_v16  ;;  %491 = vmatprep.mubr.bf16.mxu0 %v63_v33  ;;  %v64_v45 = vpack.c.bf16 %v58_v44, %v52_v43  ;;  %v804_v47 = vld [vmem:[#allocation5 + $0x130] sm:$0xff]   ;;  %v806_v49 = vld [vmem:[#allocation5 + $0x128] sm:$0xff]   ;;  %v807_v50 = vld [vmem:[#allocation5 + $0x160] sm:$0xff]  }
  0x2d   :  { %723 = vmatpush3.bf16.msra.mxu1 %v784_v15  ;;  %532 = vmatprep.mubr.bf16.mxu1 %v65_v41  ;;  %v808_v51 = vld [vmem:[#allocation5 + $0x120] sm:$0xff]   ;;  %v809_v52 = vld [vmem:[#allocation5 + $0x158] sm:$0xff]   ;;  %v811_v54 = vld [vmem:[#allocation5 + $0x150] sm:$0xff]  }
  0x2e   :  { %724 = vmatprep.subr.bf16.mxu1 %v787_v18  ;;  %v810_v53 = vld [vmem:[#allocation5 + $0x118] sm:$0xff]   ;;  %v55_v55 = vld [vmem:[#allocation2 + $0x28] sm:$0xff]  ;;  %v812_v58 = vld [vmem:[#allocation5 + $0x110] sm:$0xff]  }
  0x2f   :  { %703 = vmatpush3.bf16.msra.mxu0 %v786_v17  ;;  %v61_v56 = vld [vmem:[#allocation2 + $0x58] sm:$0xff]  ;;  %v813_v59 = vld [vmem:[#allocation5 + $0x148] sm:$0xff]   ;;  %v815_v61 = vld [vmem:[#allocation5 + $0x140] sm:$0xff]  }
  0x30   :  { %704 = vmatprep.subr.bf16.mxu0 %v789_v20  ;;  %v67_v57 = vpack.c.bf16 %v61_v56, %v55_v55  ;;  %v814_v60 = vld [vmem:[#allocation5 + $0x108] sm:$0xff]   ;;  %v816_v62 = vld [vmem:[#allocation5 + $0x100] sm:$0xff]   ;;  %v60_v0 = vld [vmem:[#allocation2 + $0x50] sm:$0xff] }
  0x31   :  { %725 = vmatpush3.bf16.msra.mxu1 %v788_v19  ;;  %v54_v63 = vld [vmem:[#allocation2 + $0x20] sm:$0xff] }
  0x32   :  { %726 = vmatprep.subr.bf16.mxu1 %v791_v22  ;;  %v66_v1 = vpack.c.bf16 %v60_v0, %v54_v63  ;;  %v643_v8 = vld [vmem:[%s946_s2] ss:$0 sm:$0xff] }
  0x33   :  { %705 = vmatpush3.bf16.msra.mxu0 %v790_v21  ;;  %v693_v44 = vld [vmem:[%s948_s4] ss:$0 sm:$0xff] }
  0x34   :  { %706 = vmatprep.subr.bf16.mxu0 %v793_v24 }
  0x35   :  { %727 = vmatpush3.bf16.msra.mxu1 %v792_v23 }
  0x36   :  { %728 = vmatprep.subr.bf16.mxu1 %v795_v26 }
  0x37   :  { %707 = vmatpush3.bf16.msra.mxu0 %v794_v25 }
  0x38   :  { %708 = vmatprep.subr.bf16.mxu0 %v797_v28 }
  0x39   :  { %729 = vmatpush3.bf16.msra.mxu1 %v796_v27 }
  0x3a   :  { %730 = vmatprep.subr.bf16.mxu1 %v799_v30 }
  0x3b   :  { %709 = vmatpush3.bf16.msra.mxu0 %v798_v29 }
  0x3c   :  { %738 = vmatprep.subr.bf16.mxu0 %v801_v38 }
  0x3d   :  { %731 = vmatpush3.bf16.msra.mxu1 %v800_v34 }
  0x3e   :  { %492 = vmatmul.mubr.bf16.vlgmr.msra.gmra.mxu0 %v62_v37 }
  0x3f   :  { %739 = vmatpush3.bf16.msra.mxu0 %v802_v42  ;;  %573 = vmatprep.mubr.bf16.mxu0 %v67_v57  ;;  %v692_v42 = vld [vmem:[%s947_s3] ss:$0 sm:$0xff] }
  0x40   :  { %533 = vmatmul.mubr.bf16.vlgmr.msra.gmra.mxu1 %v64_v45  ;;  %740 = vmatprep.subr.bf16.mxu0 %v803_v46 }
  0x43   :  { %741 = vmatpush3.bf16.msra.mxu0 %v804_v47 }
  0x44   :  { %742 = vmatprep.subr.bf16.mxu0 %v805_v48 }
  0x47   :  { %743 = vmatpush3.bf16.msra.mxu0 %v806_v49 }
  0x48   :  { %744 = vmatprep.subr.bf16.mxu0 %v807_v50 }
  0x4b   :  { %745 = vmatpush3.bf16.msra.mxu0 %v808_v51 }
  0x4c   :  { %746 = vmatprep.subr.bf16.mxu0 %v809_v52 }
  0x4f   :  { %747 = vmatpush3.bf16.msra.mxu0 %v810_v53 }
  0x50   :  { %748 = vmatprep.subr.bf16.mxu0 %v811_v54 }
  0x53   :  { %749 = vmatpush3.bf16.msra.mxu0 %v812_v58 }
  0x54   :  { %750 = vmatprep.subr.bf16.mxu0 %v813_v59 }
  0x57   :  { %751 = vmatpush3.bf16.msra.mxu0 %v814_v60 }
  0x58   :  { %752 = vmatprep.subr.bf16.mxu0 %v815_v61 }
  0x5b   :  { %753 = vmatpush3.bf16.msra.mxu0 %v816_v62 }
  0x5e   :  { %574 = vmatmul.mubr.bf16.vlgmr.msra.gmra.mxu0 %v66_v1 }
  0xfe   :  { %v710_v2 = vpop.f32.mrf.mxu0 }
 0x100   :  { %v711_v3 = vpop.f32.mrf.mxu0  ;;  %v732_v4 = vpop.f32.mrf.mxu1 }
 0x101   :  { %v712_v7 = vadd.f32 %v711_v3, %v710_v2 }
 0x102   :  { %v713_v5 = vpop.f32.mrf.mxu0  ;;  %v733_v6 = vpop.f32.mrf.mxu1 }
 0x103   :  { %v494_v11 = vadd.f32 %v712_v7, %v643_v8  ;;  %v734_v12 = vadd.f32 %v733_v6, %v732_v4 }
 0x104   :  { %v714_v9 = vpop.f32.mrf.mxu0  ;;  %v735_v10 = vpop.f32.mrf.mxu1 }
 0x105   :  { %v715_v13 = vadd.f32 %v714_v9, %v713_v5  ;;  %v535_v17 = vadd.f32 %v734_v12, %v494_v11 }
 0x106   :  { %v736_v14 = vpop.f32.mrf.mxu1 }
 0x107   :  { %v497_v18 = vadd.f32 %v715_v13, %v643_v8  ;;  %v737_v19 = vadd.f32 %v736_v14, %v735_v10 }
 0x109   :  { %v538_v24 = vadd.f32 %v737_v19, %v497_v18 }
 0x11e   :  { %v754_v15 = vpop.f32.mrf.mxu0 }
 0x120   :  { %v755_v16 = vpop.f32.mrf.mxu0 }
 0x121   :  { %v756_v20 = vadd.f32 %v755_v16, %v754_v15 }
 0x122   :  { %v757_v21 = vpop.f32.mrf.mxu0 }
 0x123   :  { %v576_v22 = vadd.f32 %v756_v20, %v535_v17 }
 0x124   :  { %v758_v23 = vpop.f32.mrf.mxu0 }
 0x125   :  { %v759_v25 = vadd.f32 %v758_v23, %v757_v21  ;;  %582 = vadd.xlane.f32.xlu0 %v576_v22 }
 0x127   :  { %v579_v26 = vadd.f32 %v759_v25, %v538_v24 }
 0x129   :  { %584 = vadd.xlane.f32.xlu0 %v579_v26 }
 0x1ae   :  { %v583_v27 = vpop.xlane.xlu0 %582 }
 0x1af   :  { %v587_v28 = vmul.f32 0.0078125, %v583_v27 }
 0x1b1   :  { %v589_v29 = vsub.f32 %v576_v22, %v587_v28 }
 0x1b2   :  { %v585_v30 = vpop.xlane.xlu0 %584 }
 0x1b3   :  { %v588_v31 = vmul.f32 0.0078125, %v585_v30  ;;  %v591_v32 = vmul.f32 %v589_v29, %v589_v29 }
 0x1b5   :  { %v590_v33 = vsub.f32 %v579_v26, %v588_v31  ;;  %593 = vadd.xlane.f32.xlu1 %v591_v32 }
 0x1b7   :  { %v592_v34 = vmul.f32 %v590_v33, %v590_v33 }
 0x1b9   :  { %595 = vadd.xlane.f32.xlu1 %v592_v34 }
 0x23e   :  { %v594_v35 = vpop.xlane.xlu1 %593 }
 0x23f   :  { %v597_v36 = vmul.f32 0.0078125, %v594_v35 }
 0x241   :  { %v599_v37 = vadd.f32 1e-05, %v597_v36 }
 0x242   :  { %v596_v38 = vpop.xlane.xlu1 %595 }
 0x243   :  { %817 = vrsqrt.f32 %v599_v37  ;;  %v598_v39 = vmul.f32 0.0078125, %v596_v38 }
 0x245   :  { %v600_v40 = vadd.f32 1e-05, %v598_v39 }
 0x247   :  { %819 = vrsqrt.f32 %v600_v40 }
 0x250   :  { %v818_v41 = vpop.eup %817 }
 0x251   :  { %v603_v43 = vmul.f32 %v818_v41, %v589_v29 }
 0x253   :  { %v612_v45 = vmul.f32 %v692_v42, %v603_v43 }
 0x254   :  { %v820_v46 = vpop.eup %819 }
 0x255   :  { %v604_v47 = vmul.f32 %v820_v46, %v590_v33  ;;  %v621_v48 = vadd.f32 %v693_v44, %v612_v45 }
 0x257   :  { %v613_v49 = vmul.f32 %v692_v42, %v604_v47  ;;  %623 = vst [vmem:[#allocation7] sm:$0xff] %v621_v48 }
 0x259   :  { %v622_v50 = vadd.f32 %v693_v44, %v613_v49 }
 0x25b   :  { %624 = vst [vmem:[#allocation7 + $0x8] sm:$0xff] %v622_v50 }
 0x25c   :  { %872 = shalt.err (!%p869_p0)
}
 0x25d   :  { %s894_s3 = smov 128   ;;  %s895_s4 = smov 8  }
 0x25e   :  { %636 = dma.vmem_to_hbm [thread:$0]  %s631_s11, 256, %s949_s5, [#allocation4], %s894_s3, %s894_s3, %s895_s4  }
 0x25f   :  { %885 = dma.done.wait [#allocation4], 256  }
 0x260   :  { %886 = vsyncadd [#allocation4], 4294967040 }
 0x261   :  { %640 = vsyncpa [#allocation3], 1 }
 0x262   :  { %641 = vsyncpa [#allocation6], 1 }
 0x263   :  { %642 = vsyncpa [#allocation4], 1 }

// kernel: tpu_custom_call.1
= control target key start
LH: loop header
LB: loop body
LE: loop exit
PB: predicated region body
PF: predicated region fallthrough
CT: control target
= control target key end

     0   :  { %10 = vsyncpa [#allocation3], 0  ;;  %s944_s0 = inlined_call_operand.hbm [shape: f32[16,768], index: 0, kind: input, shape index: {}]   ;;  %s945_s1 = inlined_call_operand.hbm [shape: bf16[768,128], index: 1, kind: input, shape index: {}]   ;;  %s946_s2 = inlined_call_operand.vmem [shape: f32[1,128], index: 2, kind: input, shape index: {}]   ;;  %s947_s3 = inlined_call_operand.vmem [shape: f32[1,128], index: 3, kind: input, shape index: {}]   ;;  %s948_s4 = inlined_call_operand.vmem [shape: f32[1,128], index: 4, kind: input, shape index: {}]   ;;  %s949_s5 = inlined_call_operand.hbm [shape: f32[16,128], index: 5, kind: output, shape index: {}]  }
   0x1   :  { %11 = vsyncpa [#allocation6], 0 }
   0x2   :  { %12 = vsyncpa [#allocation4], 0  ;;  %s887_s18 = smov [#allocation2]  }
   0x3   :  { %s18_s19 = sshll.u32 %s887_s18, 4  ;;  %s19_s19 = int_to_ptr.vmem [resolvable:$true] %s18_s19 }
   0x4   :  { %s829_s20 = scalar_lea.vmem %s19_s19, 1536  ;;  %p834_p1 = scmp.lt.s32.totalorder %s19_s19, %s19_s19 }
   0x5   :  { %p830_p0 = scmp.ne.s32.totalorder %s19_s19, %s829_s20  ;;  %p835_p2 = scmp.lt.s32.totalorder %s829_s20, %s829_s20 }
   0x7   :  { %p836_p3 = por %p835_p2, %p834_p1 }
   0x9   :  { %p837_p4 = pnand %p836_p3, %p830_p0 }
   0xb   :  { %840 = shalt.err (!%p837_p4)
}
   0xc   :  { %s888_s21 = smov 768   ;;  %s889_s22 = smov 48  }
   0xd   :  { %24 = dma.hbm_to_vmem [thread:$0]  %s944_s0, 1536, %s19_s19, [#allocation3], %s888_s21, %s888_s21, %s889_s22  }
   0xe   :  { %s890_s25 = smov [#allocation5]  }
   0xf   :  { %s30_s26 = sshll.u32 %s890_s25, 4  ;;  %s31_s26 = int_to_ptr.vmem [resolvable:$true] %s30_s26 }
  0x10   :  { %s849_s27 = scalar_lea.vmem %s31_s26, 6144  ;;  %p854_p6 = scmp.lt.s32.totalorder %s31_s26, %s31_s26 }
  0x11   :  { %p850_p5 = scmp.ne.s32.totalorder %s31_s26, %s849_s27  ;;  %p855_p7 = scmp.lt.s32.totalorder %s849_s27, %s849_s27 }
  0x13   :  { %p856_p8 = por %p855_p7, %p854_p6 }
  0x15   :  { %p857_p9 = pnand %p856_p8, %p850_p5 }
  0x17   :  { %860 = shalt.err (!%p857_p9)
}
  0x18   :  { %s891_s28 = smov 64   ;;  %s892_s29 = smov 4  }
  0x19   :  { %36 = dma.hbm_to_vmem [thread:$0]  %s945_s1, 6144, %s31_s26, [#allocation6], %s891_s28, %s891_s28, %s892_s29  }
  0x1a   :  { %881 = dma.done.wait [#allocation3], 1536  }
  0x1b   :  { %882 = vsyncadd [#allocation3], 4294965760 }
  0x1c   :  { %883 = dma.done.wait [#allocation6], 6144  }
  0x1d   :  { %884 = vsyncadd [#allocation6], 4294961152  ;;  %v769_v0 = vld [vmem:[#allocation5 + $0x78] sm:$0xff]   ;;  %v773_v4 = vld [vmem:[#allocation5 + $0x70] sm:$0xff]   ;;  %s893_s10 = smov [#allocation7]  }
  0x1e   :  { %v770_v1 = vld [vmem:[#allocation5 + $0x38] sm:$0xff]   ;;  %694 = vmatprep.subr.bf16.mxu0 %v769_v0  ;;  %v774_v5 = vld [vmem:[#allocation5 + $0x30] sm:$0xff]   ;;  %v777_v8 = vld [vmem:[#allocation5 + $0x68] sm:$0xff]   ;;  %s630_s11 = sshll.u32 %s893_s10, 4  ;;  %s631_s11 = int_to_ptr.vmem [resolvable:$true] %s630_s11 }
  0x1f   :  { %v771_v2 = vld [vmem:[#allocation5 + $0xf8] sm:$0xff]   ;;  %695 = vmatpush3.bf16.msra.mxu0 %v770_v1  ;;  %v775_v6 = vld [vmem:[#allocation5 + $0xf0] sm:$0xff]   ;;  %v778_v9 = vld [vmem:[#allocation5 + $0x28] sm:$0xff]   ;;  %s861_s12 = scalar_lea.vmem %s631_s11, 256  ;;  %p866_p11 = scmp.lt.s32.totalorder %s631_s11, %s631_s11 }
  0x20   :  { %v772_v3 = vld [vmem:[#allocation5 + $0xb8] sm:$0xff]   ;;  %716 = vmatprep.subr.bf16.mxu1 %v771_v2  ;;  %696 = vmatprep.subr.bf16.mxu0 %v773_v4  ;;  %v776_v7 = vld [vmem:[#allocation5 + $0xb0] sm:$0xff]   ;;  %v779_v10 = vld [vmem:[#allocation5 + $0xe8] sm:$0xff]   ;;  %p862_p10 = scmp.ne.s32.totalorder %s631_s11, %s861_s12  ;;  %p867_p12 = scmp.lt.s32.totalorder %s861_s12, %s861_s12 }
  0x21   :  { %717 = vmatpush3.bf16.msra.mxu1 %v772_v3  ;;  %v780_v11 = vld [vmem:[#allocation5 + $0xa8] sm:$0xff]   ;;  %v781_v12 = vld [vmem:[#allocation5 + $0x60] sm:$0xff]   ;;  %v785_v16 = vld [vmem:[#allocation5 + $0x58] sm:$0xff]  }
  0x22   :  { %718 = vmatprep.subr.bf16.mxu1 %v775_v6  ;;  %v782_v13 = vld [vmem:[#allocation5 + $0x20] sm:$0xff]   ;;  %v786_v17 = vld [vmem:[#allocation5 + $0x18] sm:$0xff]   ;;  %v789_v20 = vld [vmem:[#allocation5 + $0x50] sm:$0xff]   ;;  %p868_p13 = por %p867_p12, %p866_p11 }
  0x23   :  { %697 = vmatpush3.bf16.msra.mxu0 %v774_v5  ;;  %v783_v14 = vld [vmem:[#allocation5 + $0xe0] sm:$0xff]   ;;  %v787_v18 = vld [vmem:[#allocation5 + $0xd8] sm:$0xff]   ;;  %v790_v21 = vld [vmem:[#allocation5 + $0x10] sm:$0xff]  }
  0x24   :  { %698 = vmatprep.subr.bf16.mxu0 %v777_v8  ;;  %v784_v15 = vld [vmem:[#allocation5 + $0xa0] sm:$0xff]   ;;  %v788_v19 = vld [vmem:[#allocation5 + $0x98] sm:$0xff]   ;;  %v791_v22 = vld [vmem:[#allocation5 + $0xd0] sm:$0xff]   ;;  %p869_p0 = pnand %p868_p13, %p862_p10 }
  0x25   :  { %719 = vmatpush3.bf16.msra.mxu1 %v776_v7  ;;  %v792_v23 = vld [vmem:[#allocation5 + $0x90] sm:$0xff]   ;;  %v793_v24 = vld [vmem:[#allocation5 + $0x48] sm:$0xff]   ;;  %v797_v28 = vld [vmem:[#allocation5 + $0x40] sm:$0xff]  }
  0x26   :  { %720 = vmatprep.subr.bf16.mxu1 %v779_v10  ;;  %v794_v25 = vld [vmem:[#allocation5 + $0x8] sm:$0xff]   ;;  %v798_v29 = vld [vmem:[#allocation5] sm:$0xff]   ;;  %v57_v32 = vld [vmem:[#allocation2 + $0x38] sm:$0xff] }
  0x27   :  { %699 = vmatpush3.bf16.msra.mxu0 %v778_v9  ;;  %v795_v26 = vld [vmem:[#allocation5 + $0xc8] sm:$0xff]   ;;  %v799_v30 = vld [vmem:[#allocation5 + $0xc0] sm:$0xff]   ;;  %v56_v36 = vld [vmem:[#allocation2 + $0x30] sm:$0xff] }
  0x28   :  { %700 = vmatprep.subr.bf16.mxu0 %v781_v12  ;;  %v796_v27 = vld [vmem:[#allocation5 + $0x88] sm:$0xff]   ;;  %v800_v34 = vld [vmem:[#allocation5 + $0x80] sm:$0xff]   ;;  %v801_v38 = vld [vmem:[#allocation5 + $0x178] sm:$0xff]  }
  0x29   :  { %721 = vmatpush3.bf16.msra.mxu1 %v780_v11  ;;  %v51_v31 = vld [vmem:[#allocation2 + $0x8] sm:$0xff]  ;;  %v50_v35 = vld [vmem:[#allocation2] sm:$0xff]  ;;  %v53_v39 = vld [vmem:[#allocation2 + $0x18] sm:$0xff] }
  0x2a   :  { %722 = vmatprep.subr.bf16.mxu1 %v783_v14  ;;  %v63_v33 = vpack.c.bf16 %v57_v32, %v51_v31  ;;  %v62_v37 = vpack.c.bf16 %v56_v36, %v50_v35  ;;  %v59_v40 = vld [vmem:[#allocation2 + $0x48] sm:$0xff]  ;;  %v802_v42 = vld [vmem:[#allocation5 + $0x138] sm:$0xff]   ;;  %v52_v43 = vld [vmem:[#allocation2 + $0x10] sm:$0xff] }
  0x2b   :  { %701 = vmatpush3.bf16.msra.mxu0 %v782_v13  ;;  %v65_v41 = vpack.c.bf16 %v59_v40, %v53_v39  ;;  %v58_v44 = vld [vmem:[#allocation2 + $0x40] sm:$0xff]  ;;  %v803_v46 = vld [vmem:[#allocation5 + $0x170] sm:$0xff]   ;;  %v805_v48 = vld [vmem:[#allocation5 + $0x168] sm:$0xff]  }
  0x2c   :  { %702 = vmatprep.subr.bf16.mxu0 %v785_v16  ;;  %491 = vmatprep.mubr.bf16.mxu0 %v63_v33  ;;  %v64_v45 = vpack.c.bf16 %v58_v44, %v52_v43  ;;  %v804_v47 = vld [vmem:[#allocation5 + $0x130] sm:$0xff]   ;;  %v806_v49 = vld [vmem:[#allocation5 + $0x128] sm:$0xff]   ;;  %v807_v50 = vld [vmem:[#allocation5 + $0x160] sm:$0xff]  }
  0x2d   :  { %723 = vmatpush3.bf16.msra.mxu1 %v784_v15  ;;  %532 = vmatprep.mubr.bf16.mxu1 %v65_v41  ;;  %v808_v51 = vld [vmem:[#allocation5 + $0x120] sm:$0xff]   ;;  %v809_v52 = vld [vmem:[#allocation5 + $0x158] sm:$0xff]   ;;  %v811_v54 = vld [vmem:[#allocation5 + $0x150] sm:$0xff]  }
  0x2e   :  { %724 = vmatprep.subr.bf16.mxu1 %v787_v18  ;;  %v810_v53 = vld [vmem:[#allocation5 + $0x118] sm:$0xff]   ;;  %v55_v55 = vld [vmem:[#allocation2 + $0x28] sm:$0xff]  ;;  %v812_v58 = vld [vmem:[#allocation5 + $0x110] sm:$0xff]  }
  0x2f   :  { %703 = vmatpush3.bf16.msra.mxu0 %v786_v17  ;;  %v61_v56 = vld [vmem:[#allocation2 + $0x58] sm:$0xff]  ;;  %v813_v59 = vld [vmem:[#allocation5 + $0x148] sm:$0xff]   ;;  %v815_v61 = vld [vmem:[#allocation5 + $0x140] sm:$0xff]  }
  0x30   :  { %704 = vmatprep.subr.bf16.mxu0 %v789_v20  ;;  %v67_v57 = vpack.c.bf16 %v61_v56, %v55_v55  ;;  %v814_v60 = vld [vmem:[#allocation5 + $0x108] sm:$0xff]   ;;  %v816_v62 = vld [vmem:[#allocation5 + $0x100] sm:$0xff]   ;;  %v60_v0 = vld [vmem:[#allocation2 + $0x50] sm:$0xff] }
  0x31   :  { %725 = vmatpush3.bf16.msra.mxu1 %v788_v19  ;;  %v54_v63 = vld [vmem:[#allocation2 + $0x20] sm:$0xff] }
  0x32   :  { %726 = vmatprep.subr.bf16.mxu1 %v791_v22  ;;  %v66_v1 = vpack.c.bf16 %v60_v0, %v54_v63  ;;  %v643_v8 = vld [vmem:[%s946_s2] ss:$0 sm:$0xff] }
  0x33   :  { %705 = vmatpush3.bf16.msra.mxu0 %v790_v21  ;;  %v693_v44 = vld [vmem:[%s948_s4] ss:$0 sm:$0xff] }
  0x34   :  { %706 = vmatprep.subr.bf16.mxu0 %v793_v24 }
  0x35   :  { %727 = vmatpush3.bf16.msra.mxu1 %v792_v23 }
  0x36   :  { %728 = vmatprep.subr.bf16.mxu1 %v795_v26 }
  0x37   :  { %707 = vmatpush3.bf16.msra.mxu0 %v794_v25 }
  0x38   :  { %708 = vmatprep.subr.bf16.mxu0 %v797_v28 }
  0x39   :  { %729 = vmatpush3.bf16.msra.mxu1 %v796_v27 }
  0x3a   :  { %730 = vmatprep.subr.bf16.mxu1 %v799_v30 }
  0x3b   :  { %709 = vmatpush3.bf16.msra.mxu0 %v798_v29 }
  0x3c   :  { %738 = vmatprep.subr.bf16.mxu0 %v801_v38 }
  0x3d   :  { %731 = vmatpush3.bf16.msra.mxu1 %v800_v34 }
  0x3e   :  { %492 = vmatmul.mubr.bf16.vlgmr.msra.gmra.mxu0 %v62_v37 }
  0x3f   :  { %739 = vmatpush3.bf16.msra.mxu0 %v802_v42  ;;  %573 = vmatprep.mubr.bf16.mxu0 %v67_v57  ;;  %v692_v42 = vld [vmem:[%s947_s3] ss:$0 sm:$0xff] }
  0x40   :  { %533 = vmatmul.mubr.bf16.vlgmr.msra.gmra.mxu1 %v64_v45  ;;  %740 = vmatprep.subr.bf16.mxu0 %v803_v46 }
  0x43   :  { %741 = vmatpush3.bf16.msra.mxu0 %v804_v47 }
  0x44   :  { %742 = vmatprep.subr.bf16.mxu0 %v805_v48 }
  0x47   :  { %743 = vmatpush3.bf16.msra.mxu0 %v806_v49 }
  0x48   :  { %744 = vmatprep.subr.bf16.mxu0 %v807_v50 }
  0x4b   :  { %745 = vmatpush3.bf16.msra.mxu0 %v808_v51 }
  0x4c   :  { %746 = vmatprep.subr.bf16.mxu0 %v809_v52 }
  0x4f   :  { %747 = vmatpush3.bf16.msra.mxu0 %v810_v53 }
  0x50   :  { %748 = vmatprep.subr.bf16.mxu0 %v811_v54 }
  0x53   :  { %749 = vmatpush3.bf16.msra.mxu0 %v812_v58 }
  0x54   :  { %750 = vmatprep.subr.bf16.mxu0 %v813_v59 }
  0x57   :  { %751 = vmatpush3.bf16.msra.mxu0 %v814_v60 }
  0x58   :  { %752 = vmatprep.subr.bf16.mxu0 %v815_v61 }
  0x5b   :  { %753 = vmatpush3.bf16.msra.mxu0 %v816_v62 }
  0x5e   :  { %574 = vmatmul.mubr.bf16.vlgmr.msra.gmra.mxu0 %v66_v1 }
  0xfe   :  { %v710_v2 = vpop.f32.mrf.mxu0 }
 0x100   :  { %v711_v3 = vpop.f32.mrf.mxu0  ;;  %v732_v4 = vpop.f32.mrf.mxu1 }
 0x101   :  { %v712_v7 = vadd.f32 %v711_v3, %v710_v2 }
 0x102   :  { %v713_v5 = vpop.f32.mrf.mxu0  ;;  %v733_v6 = vpop.f32.mrf.mxu1 }
 0x103   :  { %v494_v11 = vadd.f32 %v712_v7, %v643_v8  ;;  %v734_v12 = vadd.f32 %v733_v6, %v732_v4 }
 0x104   :  { %v714_v9 = vpop.f32.mrf.mxu0  ;;  %v735_v10 = vpop.f32.mrf.mxu1 }
 0x105   :  { %v715_v13 = vadd.f32 %v714_v9, %v713_v5  ;;  %v535_v17 = vadd.f32 %v734_v12, %v494_v11 }
 0x106   :  { %v736_v14 = vpop.f32.mrf.mxu1 }
 0x107   :  { %v497_v18 = vadd.f32 %v715_v13, %v643_v8  ;;  %v737_v19 = vadd.f32 %v736_v14, %v735_v10 }
 0x109   :  { %v538_v24 = vadd.f32 %v737_v19, %v497_v18 }
 0x11e   :  { %v754_v15 = vpop.f32.mrf.mxu0 }
 0x120   :  { %v755_v16 = vpop.f32.mrf.mxu0 }
 0x121   :  { %v756_v20 = vadd.f32 %v755_v16, %v754_v15 }
 0x122   :  { %v757_v21 = vpop.f32.mrf.mxu0 }
 0x123   :  { %v576_v22 = vadd.f32 %v756_v20, %v535_v17 }
 0x124   :  { %v758_v23 = vpop.f32.mrf.mxu0 }
 0x125   :  { %v759_v25 = vadd.f32 %v758_v23, %v757_v21  ;;  %582 = vadd.xlane.f32.xlu0 %v576_v22 }
 0x127   :  { %v579_v26 = vadd.f32 %v759_v25, %v538_v24 }
 0x129   :  { %584 = vadd.xlane.f32.xlu0 %v579_v26 }
 0x1ae   :  { %v583_v27 = vpop.xlane.xlu0 %582 }
 0x1af   :  { %v587_v28 = vmul.f32 0.0078125, %v583_v27 }
 0x1b1   :  { %v589_v29 = vsub.f32 %v576_v22, %v587_v28 }
 0x1b2   :  { %v585_v30 = vpop.xlane.xlu0 %584 }
 0x1b3   :  { %v588_v31 = vmul.f32 0.0078125, %v585_v30  ;;  %v591_v32 = vmul.f32 %v589_v29, %v589_v29 }
 0x1b5   :  { %v590_v33 = vsub.f32 %v579_v26, %v588_v31  ;;  %593 = vadd.xlane.f32.xlu1 %v591_v32 }
 0x1b7   :  { %v592_v34 = vmul.f32 %v590_v33, %v590_v33 }
 0x1b9   :  { %595 = vadd.xlane.f32.xlu1 %v592_v34 }
 0x23e   :  { %v594_v35 = vpop.xlane.xlu1 %593 }
 0x23f   :  { %v597_v36 = vmul.f32 0.0078125, %v594_v35 }
 0x241   :  { %v599_v37 = vadd.f32 1e-05, %v597_v36 }
 0x242   :  { %v596_v38 = vpop.xlane.xlu1 %595 }
 0x243   :  { %817 = vrsqrt.f32 %v599_v37  ;;  %v598_v39 = vmul.f32 0.0078125, %v596_v38 }
 0x245   :  { %v600_v40 = vadd.f32 1e-05, %v598_v39 }
 0x247   :  { %819 = vrsqrt.f32 %v600_v40 }
 0x250   :  { %v818_v41 = vpop.eup %817 }
 0x251   :  { %v603_v43 = vmul.f32 %v818_v41, %v589_v29 }
 0x253   :  { %v612_v45 = vmul.f32 %v692_v42, %v603_v43 }
 0x254   :  { %v820_v46 = vpop.eup %819 }
 0x255   :  { %v604_v47 = vmul.f32 %v820_v46, %v590_v33  ;;  %v621_v48 = vadd.f32 %v693_v44, %v612_v45 }
 0x257   :  { %v613_v49 = vmul.f32 %v692_v42, %v604_v47  ;;  %623 = vst [vmem:[#allocation7] sm:$0xff] %v621_v48 }
 0x259   :  { %v622_v50 = vadd.f32 %v693_v44, %v613_v49 }
 0x25b   :  { %624 = vst [vmem:[#allocation7 + $0x8] sm:$0xff] %v622_v50 }
 0x25c   :  { %872 = shalt.err (!%p869_p0)
}
 0x25d   :  { %s894_s3 = smov 128   ;;  %s895_s4 = smov 8  }
 0x25e   :  { %636 = dma.vmem_to_hbm [thread:$0]  %s631_s11, 256, %s949_s5, [#allocation4], %s894_s3, %s894_s3, %s895_s4  }
 0x25f   :  { %885 = dma.done.wait [#allocation4], 256  }
 0x260   :  { %886 = vsyncadd [#allocation4], 4294967040 }
 0x261   :  { %640 = vsyncpa [#allocation3], 1 }
 0x262   :  { %641 = vsyncpa [#allocation6], 1 }
 0x263   :  { %642 = vsyncpa [#allocation4], 1 }

</bundles_post_ra>
